<compile_context>
chip_gen: v5e
topology: v5e:2x2
jax: 0.10.0
libtpu: 0.0.40
codegen_flags: <defaults>
</compile_context>

<pallas_src>
from functools import partial

import jax
import jax.numpy as jnp
from jax.experimental import pallas as pl
from jax.experimental.pallas import tpu as pltpu


def _contrast_kernel(pred_ref, fea_ref, gather_ref, coef_ref, queues_ref,
                     out_ref, proto_ref, cnt_ref, *,
                     num_classes, queue_len, temperature):
    # pred_ref   : (1, 1, HWc) int32   per-pixel class id (gt or argmax), -1 = pad
    # fea_ref    : (1, HWc, P) bf16    features, pixel-major
    # gather_ref : (1, C, C)   f32     row c = one-hot of "previous present class"
    # coef_ref   : (1, C, 1)   f32     active-mask / len(vals)
    # queues_ref : (P, C*Q)    bf16    stacked class queues, cols [c*Q:(c+1)*Q]
    # out_ref    : (1, 1, 1)   f32     per-sample loss contribution
    # proto_ref  : (C, P)      f32     scratch: running sum of class features
    # cnt_ref    : (C, 1)      f32     scratch: running per-class pixel counts
    C = num_classes
    Q = queue_len
    k = pl.program_id(1)
    nk = pl.num_programs(1)

    @pl.when(k == 0)
    def _init():
        proto_ref[...] = jnp.zeros_like(proto_ref)
        cnt_ref[...] = jnp.zeros_like(cnt_ref)

    # ---- per-chunk accumulation (memory-bound part) -------------------------
    pred = pred_ref[0]                                           # [1, HWc] int32
    fea = fea_ref[0]                                             # [HWc, P] bf16
    cls = jax.lax.broadcasted_iota(jnp.int32, (C, pred.shape[1]), 0)
    hit = (pred == cls)                                          # [C, HWc] bool (pad -> False)
    cnt_ref[...] += jnp.sum(hit.astype(jnp.float32), axis=1, keepdims=True)   # [C, 1]
    proto_ref[...] += jnp.dot(hit.astype(jnp.bfloat16), fea,
                              preferred_element_type=jnp.float32)              # [C, P]

    # ---- tail: queries, similarities, contrastive loss ----------------------
    @pl.when(k == nk - 1)
    def _tail():
        proto = proto_ref[...] / jnp.maximum(cnt_ref[...], 1.0)  # masked mean   [C, P]
        gather = gather_ref[0]                                   # [C, C]
        # PyTorch quirk: query for class c = prototype of the previous present class.
        query = jnp.dot(gather, proto,
                        preferred_element_type=jnp.float32)      # [C, P]
        nrm = jnp.sqrt(jnp.sum(query * query, axis=1, keepdims=True))
        # fold F.normalize(dim=1) and 1/temperature into a single per-row scale
        scale = 1.0 / (jnp.maximum(nrm, 1e-12) * temperature)    # [C, 1]
        q_s = (query * scale).astype(jnp.bfloat16)               # [C, P]

        sims = jnp.dot(q_s, queues_ref[...],
                       preferred_element_type=jnp.float32)       # logits / T   [C, C*Q]

        # row-max shift (mathematically identical, guards exp overflow)
        rowmax = jnp.max(sims, axis=1, keepdims=True)            # [C, 1]

        # process the C*Q width in Q-wide class blocks: only `sims` stays
        # full-width, exp/log work on [C, Q] pieces (no diag mask / l_neg temps).
        row_iota = jax.lax.broadcasted_iota(jnp.int32, (C, Q), 0)
        total = jnp.zeros((C, 1), jnp.float32)
        lpos = jnp.zeros((C, Q), jnp.float32)                    # shifted l_pos
        for b in range(C):                                       # static unroll, C small
            s_b = sims[:, b * Q:(b + 1) * Q] - rowmax            # [C, Q]
            total = total + jnp.sum(jnp.exp(s_b), axis=1, keepdims=True)
            lpos = lpos + jnp.where(row_iota == b, s_b, 0.0)     # pick row b of block b

        e_pos = jnp.exp(lpos)                                    # [C, Q]
        own = jnp.sum(e_pos, axis=1, keepdims=True)              # [C, 1]
        neg = total - own                                        # off-diagonal sum (shifted)
        # mean_q( l_pos - log(exp(l_pos) + neg) ), shift-invariant form
        log_prob = jnp.sum(lpos - jnp.log(e_pos + neg), axis=1,
                           keepdims=True) * (1.0 / Q)            # [C, 1]
        contrib = coef_ref[0] * (-log_prob)                      # [C, 1]
        out_ref[0] = jnp.sum(contrib, axis=0, keepdims=True)     # [1, 1]


def contrast_loss_forward(res1, fea1, label_bs, gt, queues, temperature=0.2,
                          hw_chunk_target=4096):
    """Replicates ContrastLoss.forward(res1, fea1, label_bs, gt, ema=False)."""
    bs, C, H, W = res1.shape
    _, P, _, _ = fea1.shape
    _, _, Q = queues.shape
    HW = H * W

    # prediction per pixel: gt for labeled samples, argmax(res) otherwise
    pred_from_res = jnp.argmax(res1, axis=1).reshape(bs, HW).astype(jnp.int32)
    if label_bs > 0:
        gt_flat = gt.reshape(label_bs, HW).astype(jnp.int32)
        pad = jnp.zeros((bs - label_bs, HW), jnp.int32)
        gt_full = jnp.concatenate([gt_flat, pad], axis=0)
        is_labeled = (jnp.arange(bs) < label_bs)[:, None]
        pred = jnp.where(is_labeled, gt_full, pred_from_res)
    else:
        pred = pred_from_res

    cls_ids = jnp.arange(C, dtype=jnp.int32)
    present = jnp.any(pred[:, None, :] == cls_ids[None, :, None], axis=-1)    # [bs, C]

    # previous present class (largest present class index strictly below c)
    lt = cls_ids[:, None] > cls_ids[None, :]                                  # c' < c
    cand = jnp.where(lt[None] & present[:, None, :], cls_ids[None, None, :], -1)
    prev_idx = jnp.max(cand, axis=-1)                                         # [bs, C]
    active = present & (prev_idx >= 0)               # c in vals (= unique[1:])
    prev_idx = jnp.maximum(prev_idx, 0)
    gather_mat = jax.nn.one_hot(prev_idx, C, dtype=jnp.float32)               # [bs, C, C]

    # len(vals) = (#unique classes) - 1 ; ZeroDivisionError branch -> contribute 0
    num_present = jnp.sum(present, axis=-1)
    len_vals = num_present - 1
    inv_len = jnp.where(len_vals > 0,
                        1.0 / jnp.maximum(len_vals, 1).astype(jnp.float32), 0.0)
    coef = (active.astype(jnp.float32) * inv_len[:, None]).reshape(bs, C, 1)

    # features pixel-major + bf16 (halves kernel HBM traffic; XLA fuses the
    # transpose with the cast; plain [C,HWc]@[HWc,P] MXU matmul in-kernel)
    fea_bf = jnp.transpose(fea1.reshape(bs, P, HW), (0, 2, 1)).astype(jnp.bfloat16)

    # queues [C, P, Q] -> [P, C*Q]: column j = class (j // Q), slot (j % Q)
    queues_flat = jnp.transpose(queues, (1, 0, 2)).reshape(P, C * Q).astype(jnp.bfloat16)

    # HW chunking: keep fea blocks ~2 MiB and lane/sublane aligned; pad the pixel
    # axis so chunks divide exactly (padded pixels get class -1 -> zero one-hot,
    # padded fea is 0, so they contribute nothing).
    if HW >= hw_chunk_target:
        hw_chunk = hw_chunk_target
    else:
        hw_chunk = max(128, ((HW + 127) // 128) * 128)
    hw_pad = ((HW + hw_chunk - 1) // hw_chunk) * hw_chunk
    num_chunks = hw_pad // hw_chunk
    if hw_pad != HW:
        pred = jnp.pad(pred, ((0, 0), (0, hw_pad - HW)), constant_values=-1)
        fea_bf = jnp.pad(fea_bf, ((0, 0), (0, hw_pad - HW), (0, 0)))
    pred3 = pred.reshape(bs, 1, hw_pad)

    kernel = partial(_contrast_kernel, num_classes=int(C), queue_len=int(Q),
                     temperature=float(temperature))
    per_sample = pl.pallas_call(
        kernel,
        out_shape=jax.ShapeDtypeStruct((bs, 1, 1), jnp.float32),
        grid_spec=pltpu.PrefetchScalarGridSpec(
            num_scalar_prefetch=0,
            grid=(bs, num_chunks),
            in_specs=[
                pl.BlockSpec((1, 1, hw_chunk), lambda i, k: (i, 0, k)),   # pred ids
                pl.BlockSpec((1, hw_chunk, P), lambda i, k: (i, k, 0)),   # features (bf16)
                pl.BlockSpec((1, C, C), lambda i, k: (i, 0, 0)),          # prev-class gather
                pl.BlockSpec((1, C, 1), lambda i, k: (i, 0, 0)),          # active / len(vals)
                pl.BlockSpec((P, C * Q), lambda i, k: (0, 0)),            # stacked queues
            ],
            out_specs=pl.BlockSpec((1, 1, 1), lambda i, k: (i, 0, 0)),
            scratch_shapes=[pltpu.VMEM((C, P), jnp.float32),              # proto sums
                            pltpu.VMEM((C, 1), jnp.float32)],             # pixel counts
        ),
        compiler_params=pltpu.CompilerParams(
            dimension_semantics=("parallel", "arbitrary")),
    )(pred3, fea_bf, gather_mat, coef, queues_flat)

    # contrast_loss_total / bs
    return jnp.sum(per_sample) / bs


# TODO(synk): ema=True branch (_dequeue_and_enqueue stateful queue/ptr buffer
# mutation) has no functional forward output and is not implemented.

if __name__ == "__main__":
    num_classes, inner_planes, queue_len = 5, 256, 64
    temperature = 0.2
    bs, H, W = 2, 16, 16
    label_bs = 1

    key = jax.random.PRNGKey(0)
    k1, k2, k3, k4 = jax.random.split(key, 4)
    res1 = jax.random.normal(k1, (bs, num_classes, H, W), dtype=jnp.float32)
    fea1 = jax.random.normal(k2, (bs, inner_planes, H, W), dtype=jnp.float32)
    gt = jax.random.randint(k3, (label_bs, H, W), 0, num_classes, dtype=jnp.int32)

    # deterministic stand-in for the registered buffers:
    # queue_i = F.normalize(randn(inner_planes, queue_len), dim=0)
    queues = jax.random.normal(k4, (num_classes, inner_planes, queue_len),
                               dtype=jnp.float32)
    queues = queues / jnp.maximum(
        jnp.linalg.norm(queues, axis=1, keepdims=True), 1e-12)

    # small hw_chunk_target so the multi-chunk accumulation path (the one used at
    # production segmentation sizes) is exercised even at this tiny test shape.
    loss = contrast_loss_forward(res1, fea1, label_bs, gt, queues,
                                 temperature=temperature, hw_chunk_target=128)
    jax.block_until_ready(loss)
    print("KERNEL_OK")
</pallas_src>

<mosaic_0001>
module attributes {stable_mosaic.version = 11 : i64} {
  func.func @_contrast_kernel(%arg0: i32, %arg1: i32, %arg2: memref<1x1x128xi32, #tpu.memory_space<vmem>>, %arg3: memref<1x128x256xbf16, #tpu.memory_space<vmem>>, %arg4: memref<1x5x5xf32, #tpu.memory_space<vmem>>, %arg5: memref<1x5x1xf32, #tpu.memory_space<vmem>>, %arg6: memref<256x320xbf16, #tpu.memory_space<vmem>>, %arg7: memref<1x1x1xf32, #tpu.memory_space<vmem>>, %arg8: memref<5x256xf32, #tpu.memory_space<vmem>>, %arg9: memref<5x1xf32, #tpu.memory_space<vmem>>) attributes {dimension_semantics = [#tpu.dimension_semantics<parallel>, #tpu.dimension_semantics<arbitrary>], iteration_bounds = array<i64: 2, 2>, scalar_prefetch = 0 : i64, scratch_operands = 2 : i64, tpu.core_type = #tpu.core_type<tc>, window_params = [{transform_indices = @transform_0, window_bounds = array<i64: 1, 1, 128>}, {transform_indices = @transform_1, window_bounds = array<i64: 1, 128, 256>}, {transform_indices = @transform_2, window_bounds = array<i64: 1, 5, 5>}, {transform_indices = @transform_3, window_bounds = array<i64: 1, 5, 1>}, {pipeline_mode = #tpu.pipeline_mode<synchronous>, transform_indices = @transform_4, window_bounds = array<i64: 256, 320>}, {transform_indices = @transform_5, window_bounds = array<i64: 1, 1, 1>}]} {
    %c0_i32 = arith.constant 0 : i32
    %0 = arith.cmpi eq, %arg1, %c0_i32 : i32
    %1 = arith.extui %0 : i1 to i32
    %c0_i32_0 = arith.constant 0 : i32
    %2 = arith.cmpi ne, %1, %c0_i32_0 : i32
    scf.if %2 {
      %cst_16 = arith.constant 0.000000e+00 : f32
      %27 = vector.broadcast %cst_16 : f32 to vector<5x256xf32>
      %c0_17 = arith.constant 0 : index
      %c0_18 = arith.constant 0 : index
      %28 = vector.load %arg8[%c0_17, %c0_18] : memref<5x256xf32, #tpu.memory_space<vmem>>, vector<5x256xf32>
      tpu.vector_store %arg8[%c0_17, %c0_18], %27 {strides = array<i32>} : memref<5x256xf32, #tpu.memory_space<vmem>>, vector<5x256xf32>,
      %cst_19 = arith.constant 0.000000e+00 : f32
      %29 = vector.broadcast %cst_19 : f32 to vector<5x1xf32>
      %c0_20 = arith.constant 0 : index
      %c0_21 = arith.constant 0 : index
      %30 = vector.load %arg9[%c0_20, %c0_21] : memref<5x1xf32, #tpu.memory_space<vmem>>, vector<5x1xf32>
      tpu.vector_store %arg9[%c0_20, %c0_21], %29 {strides = array<i32>} : memref<5x1xf32, #tpu.memory_space<vmem>>, vector<5x1xf32>,
    } else {
    }
    %c0 = arith.constant 0 : index
    %c0_1 = arith.constant 0 : index
    %c0_2 = arith.constant 0 : index
    %3 = vector.load %arg2[%c0, %c0_1, %c0_2] : memref<1x1x128xi32, #tpu.memory_space<vmem>>, vector<1x1x128xi32>
    %4 = vector.shape_cast %3 : vector<1x1x128xi32> to vector<1x128xi32>
    %c0_3 = arith.constant 0 : index
    %c0_4 = arith.constant 0 : index
    %c0_5 = arith.constant 0 : index
    %5 = vector.load %arg3[%c0_3, %c0_4, %c0_5] : memref<1x128x256xbf16, #tpu.memory_space<vmem>>, vector<1x128x256xbf16>
    %6 = vector.shape_cast %5 : vector<1x128x256xbf16> to vector<128x256xbf16>
    %7 = tpu.iota {dimensions = array<i32: 0>} : vector<5x128xi32>
    %8 = vector.broadcast %4 : vector<1x128xi32> to vector<5x128xi32>
    %9 = arith.cmpi eq, %8, %7 : vector<5x128xi32>
    %c0_6 = arith.constant 0 : index
    %c0_7 = arith.constant 0 : index
    %10 = vector.load %arg9[%c0_6, %c0_7] : memref<5x1xf32, #tpu.memory_space<vmem>>, vector<5x1xf32>
    %11 = arith.extui %9 : vector<5x128xi1> to vector<5x128xi32>
    %12 = arith.sitofp %11 : vector<5x128xi32> to vector<5x128xf32>
    %cst = arith.constant dense<0.000000e+00> : vector<5xf32>
    %13 = vector.multi_reduction <add>, %12, %cst [1] : vector<5x128xf32> to vector<5xf32>
    %14 = vector.shape_cast %13 : vector<5xf32> to vector<5x1xf32>
    %15 = arith.addf %10, %14 : vector<5x1xf32>
    %c0_8 = arith.constant 0 : index
    %c0_9 = arith.constant 0 : index
    %16 = vector.load %arg9[%c0_8, %c0_9] : memref<5x1xf32, #tpu.memory_space<vmem>>, vector<5x1xf32>
    tpu.vector_store %arg9[%c0_8, %c0_9], %15 {strides = array<i32>} : memref<5x1xf32, #tpu.memory_space<vmem>>, vector<5x1xf32>,
    %c0_10 = arith.constant 0 : index
    %c0_11 = arith.constant 0 : index
    %17 = vector.load %arg8[%c0_10, %c0_11] : memref<5x256xf32, #tpu.memory_space<vmem>>, vector<5x256xf32>
    %18 = arith.extui %9 : vector<5x128xi1> to vector<5x128xi32>
    %19 = arith.sitofp %18 : vector<5x128xi32> to vector<5x128xf32>
    %20 = arith.truncf %19 : vector<5x128xf32> to vector<5x128xbf16>
    %cst_12 = arith.constant dense<0.000000e+00> : vector<5x256xf32>
    %21 = tpu.matmul %20, %6, %cst_12 {dimension_numbers = #tpu.dot_dimension_numbers<[1], [0], [0], [1], [0, 0, 1, 1], [], []>} : vector<5x128xbf16>, vector<128x256xbf16>, vector<5x256xf32> -> vector<5x256xf32>
    %22 = arith.addf %17, %21 : vector<5x256xf32>
    %c0_13 = arith.constant 0 : index
    %c0_14 = arith.constant 0 : index
    %23 = vector.load %arg8[%c0_13, %c0_14] : memref<5x256xf32, #tpu.memory_space<vmem>>, vector<5x256xf32>
    tpu.vector_store %arg8[%c0_13, %c0_14], %22 {strides = array<i32>} : memref<5x256xf32, #tpu.memory_space<vmem>>, vector<5x256xf32>,
    %c1_i32 = arith.constant 1 : i32
    %24 = arith.cmpi eq, %arg1, %c1_i32 : i32
    %25 = arith.extui %24 : i1 to i32
    %c0_i32_15 = arith.constant 0 : i32
    %26 = arith.cmpi ne, %25, %c0_i32_15 : i32
    scf.if %26 {
      %c0_16 = arith.constant 0 : index
      %c0_17 = arith.constant 0 : index
      %27 = vector.load %arg8[%c0_16, %c0_17] : memref<5x256xf32, #tpu.memory_space<vmem>>, vector<5x256xf32>
      %c0_18 = arith.constant 0 : index
      %c0_19 = arith.constant 0 : index
      %28 = vector.load %arg9[%c0_18, %c0_19] : memref<5x1xf32, #tpu.memory_space<vmem>>, vector<5x1xf32>
      %cst_20 = arith.constant 1.000000e+00 : f32
      %29 = vector.broadcast %cst_20 : f32 to vector<5x1xf32>
      %30 = arith.maximumf %28, %29 : vector<5x1xf32>
      %31 = vector.broadcast %30 : vector<5x1xf32> to vector<5x256xf32>
      %32 = arith.divf %27, %31 : vector<5x256xf32>
      %c0_21 = arith.constant 0 : index
      %c0_22 = arith.constant 0 : index
      %c0_23 = arith.constant 0 : index
      %33 = vector.load %arg4[%c0_21, %c0_22, %c0_23] : memref<1x5x5xf32, #tpu.memory_space<vmem>>, vector<1x5x5xf32>
      %34 = vector.shape_cast %33 : vector<1x5x5xf32> to vector<5x5xf32>
      %cst_24 = arith.constant dense<0.000000e+00> : vector<5x256xf32>
      %35 = tpu.matmul %34, %32, %cst_24 {dimension_numbers = #tpu.dot_dimension_numbers<[1], [0], [0], [1], [0, 0, 1, 1], [], []>} : vector<5x5xf32>, vector<5x256xf32>, vector<5x256xf32> -> vector<5x256xf32>
      %36 = arith.mulf %35, %35 : vector<5x256xf32>
      %cst_25 = arith.constant dense<0.000000e+00> : vector<5xf32>
      %37 = vector.multi_reduction <add>, %36, %cst_25 [1] : vector<5x256xf32> to vector<5xf32>
      %38 = vector.shape_cast %37 : vector<5xf32> to vector<5x1xf32>
      %39 = math.sqrt %38 : vector<5x1xf32>
      %cst_26 = arith.constant 9.99999996E-13 : f32
      %40 = vector.broadcast %cst_26 : f32 to vector<5x1xf32>
      %41 = arith.maximumf %39, %40 : vector<5x1xf32>
      %cst_27 = arith.constant 2.000000e-01 : f32
      %42 = vector.broadcast %cst_27 : f32 to vector<5x1xf32>
      %43 = arith.mulf %41, %42 : vector<5x1xf32>
      %cst_28 = arith.constant 1.000000e+00 : f32
      %44 = vector.broadcast %cst_28 : f32 to vector<5x1xf32>
      %45 = arith.divf %44, %43 : vector<5x1xf32>
      %46 = vector.broadcast %45 : vector<5x1xf32> to vector<5x256xf32>
      %47 = arith.mulf %35, %46 : vector<5x256xf32>
      %48 = arith.truncf %47 : vector<5x256xf32> to vector<5x256xbf16>
      %c0_29 = arith.constant 0 : index
      %c0_30 = arith.constant 0 : index
      %49 = vector.load %arg6[%c0_29, %c0_30] : memref<256x320xbf16, #tpu.memory_space<vmem>>, vector<256x320xbf16>
      %cst_31 = arith.constant dense<0.000000e+00> : vector<5x320xf32>
      %50 = tpu.matmul %48, %49, %cst_31 {dimension_numbers = #tpu.dot_dimension_numbers<[1], [0], [0], [1], [0, 0, 1, 1], [], []>} : vector<5x256xbf16>, vector<256x320xbf16>, vector<5x320xf32> -> vector<5x320xf32>
      %cst_32 = arith.constant dense<0xFF800000> : vector<5xf32>
      %51 = vector.multi_reduction <maximumf>, %50, %cst_32 [1] : vector<5x320xf32> to vector<5xf32>
      %52 = vector.shape_cast %51 : vector<5xf32> to vector<5x1xf32>
      %53 = tpu.iota {dimensions = array<i32: 0>} : vector<5x64xi32>
      %cst_33 = arith.constant 0.000000e+00 : f32
      %54 = vector.broadcast %cst_33 : f32 to vector<5x1xf32>
      %cst_34 = arith.constant 0.000000e+00 : f32
      %55 = vector.broadcast %cst_34 : f32 to vector<5x64xf32>
      %56 = vector.extract_strided_slice %50 {offsets = [0, 0], sizes = [5, 64], strides = [1, 1]} : vector<5x320xf32> to vector<5x64xf32>
      %57 = vector.broadcast %52 : vector<5x1xf32> to vector<5x64xf32>
      %58 = arith.subf %56, %57 : vector<5x64xf32>
      %59 = math.exp %58 : vector<5x64xf32>
      %cst_35 = arith.constant dense<0.000000e+00> : vector<5xf32>
      %60 = vector.multi_reduction <add>, %59, %cst_35 [1] : vector<5x64xf32> to vector<5xf32>
      %61 = vector.shape_cast %60 : vector<5xf32> to vector<5x1xf32>
      %62 = arith.addf %54, %61 : vector<5x1xf32>
      %c0_i32_36 = arith.constant 0 : i32
      %63 = vector.broadcast %c0_i32_36 : i32 to vector<5x64xi32>
      %64 = arith.cmpi eq, %53, %63 : vector<5x64xi32>
      %cst_37 = arith.constant 0.000000e+00 : f32
      %65 = vector.broadcast %cst_37 : f32 to vector<5x64xf32>
      %66 = arith.select %64, %58, %65 : vector<5x64xi1>, vector<5x64xf32>
      %67 = arith.addf %55, %66 : vector<5x64xf32>
      %68 = vector.extract_strided_slice %50 {offsets = [0, 64], sizes = [5, 64], strides = [1, 1]} : vector<5x320xf32> to vector<5x64xf32>
      %69 = vector.broadcast %52 : vector<5x1xf32> to vector<5x64xf32>
      %70 = arith.subf %68, %69 : vector<5x64xf32>
      %71 = math.exp %70 : vector<5x64xf32>
      %cst_38 = arith.constant dense<0.000000e+00> : vector<5xf32>
      %72 = vector.multi_reduction <add>, %71, %cst_38 [1] : vector<5x64xf32> to vector<5xf32>
      %73 = vector.shape_cast %72 : vector<5xf32> to vector<5x1xf32>
      %74 = arith.addf %62, %73 : vector<5x1xf32>
      %c1_i32_39 = arith.constant 1 : i32
      %75 = vector.broadcast %c1_i32_39 : i32 to vector<5x64xi32>
      %76 = arith.cmpi eq, %53, %75 : vector<5x64xi32>
      %cst_40 = arith.constant 0.000000e+00 : f32
      %77 = vector.broadcast %cst_40 : f32 to vector<5x64xf32>
      %78 = arith.select %76, %70, %77 : vector<5x64xi1>, vector<5x64xf32>
      %79 = arith.addf %67, %78 : vector<5x64xf32>
      %80 = vector.extract_strided_slice %50 {offsets = [0, 128], sizes = [5, 64], strides = [1, 1]} : vector<5x320xf32> to vector<5x64xf32>
      %81 = vector.broadcast %52 : vector<5x1xf32> to vector<5x64xf32>
      %82 = arith.subf %80, %81 : vector<5x64xf32>
      %83 = math.exp %82 : vector<5x64xf32>
      %cst_41 = arith.constant dense<0.000000e+00> : vector<5xf32>
      %84 = vector.multi_reduction <add>, %83, %cst_41 [1] : vector<5x64xf32> to vector<5xf32>
      %85 = vector.shape_cast %84 : vector<5xf32> to vector<5x1xf32>
      %86 = arith.addf %74, %85 : vector<5x1xf32>
      %c2_i32 = arith.constant 2 : i32
      %87 = vector.broadcast %c2_i32 : i32 to vector<5x64xi32>
      %88 = arith.cmpi eq, %53, %87 : vector<5x64xi32>
      %cst_42 = arith.constant 0.000000e+00 : f32
      %89 = vector.broadcast %cst_42 : f32 to vector<5x64xf32>
      %90 = arith.select %88, %82, %89 : vector<5x64xi1>, vector<5x64xf32>
      %91 = arith.addf %79, %90 : vector<5x64xf32>
      %92 = vector.extract_strided_slice %50 {offsets = [0, 192], sizes = [5, 64], strides = [1, 1]} : vector<5x320xf32> to vector<5x64xf32>
      %93 = vector.broadcast %52 : vector<5x1xf32> to vector<5x64xf32>
      %94 = arith.subf %92, %93 : vector<5x64xf32>
      %95 = math.exp %94 : vector<5x64xf32>
      %cst_43 = arith.constant dense<0.000000e+00> : vector<5xf32>
      %96 = vector.multi_reduction <add>, %95, %cst_43 [1] : vector<5x64xf32> to vector<5xf32>
      %97 = vector.shape_cast %96 : vector<5xf32> to vector<5x1xf32>
      %98 = arith.addf %86, %97 : vector<5x1xf32>
      %c3_i32 = arith.constant 3 : i32
      %99 = vector.broadcast %c3_i32 : i32 to vector<5x64xi32>
      %100 = arith.cmpi eq, %53, %99 : vector<5x64xi32>
      %cst_44 = arith.constant 0.000000e+00 : f32
      %101 = vector.broadcast %cst_44 : f32 to vector<5x64xf32>
      %102 = arith.select %100, %94, %101 : vector<5x64xi1>, vector<5x64xf32>
      %103 = arith.addf %91, %102 : vector<5x64xf32>
      %104 = vector.extract_strided_slice %50 {offsets = [0, 256], sizes = [5, 64], strides = [1, 1]} : vector<5x320xf32> to vector<5x64xf32>
      %105 = vector.broadcast %52 : vector<5x1xf32> to vector<5x64xf32>
      %106 = arith.subf %104, %105 : vector<5x64xf32>
      %107 = math.exp %106 : vector<5x64xf32>
      %cst_45 = arith.constant dense<0.000000e+00> : vector<5xf32>
      %108 = vector.multi_reduction <add>, %107, %cst_45 [1] : vector<5x64xf32> to vector<5xf32>
      %109 = vector.shape_cast %108 : vector<5xf32> to vector<5x1xf32>
      %110 = arith.addf %98, %109 : vector<5x1xf32>
      %c4_i32 = arith.constant 4 : i32
      %111 = vector.broadcast %c4_i32 : i32 to vector<5x64xi32>
      %112 = arith.cmpi eq, %53, %111 : vector<5x64xi32>
      %cst_46 = arith.constant 0.000000e+00 : f32
      %113 = vector.broadcast %cst_46 : f32 to vector<5x64xf32>
      %114 = arith.select %112, %106, %113 : vector<5x64xi1>, vector<5x64xf32>
      %115 = arith.addf %103, %114 : vector<5x64xf32>
      %116 = math.exp %115 : vector<5x64xf32>
      %cst_47 = arith.constant dense<0.000000e+00> : vector<5xf32>
      %117 = vector.multi_reduction <add>, %116, %cst_47 [1] : vector<5x64xf32> to vector<5xf32>
      %118 = vector.shape_cast %117 : vector<5xf32> to vector<5x1xf32>
      %119 = arith.subf %110, %118 : vector<5x1xf32>
      %120 = vector.broadcast %119 : vector<5x1xf32> to vector<5x64xf32>
      %121 = arith.addf %116, %120 : vector<5x64xf32>
      %122 = math.log %121 : vector<5x64xf32>
      %123 = arith.subf %115, %122 : vector<5x64xf32>
      %cst_48 = arith.constant dense<0.000000e+00> : vector<5xf32>
      %124 = vector.multi_reduction <add>, %123, %cst_48 [1] : vector<5x64xf32> to vector<5xf32>
      %125 = vector.shape_cast %124 : vector<5xf32> to vector<5x1xf32>
      %cst_49 = arith.constant 1.562500e-02 : f32
      %126 = vector.broadcast %cst_49 : f32 to vector<5x1xf32>
      %127 = arith.mulf %125, %126 : vector<5x1xf32>
      %c0_50 = arith.constant 0 : index
      %c0_51 = arith.constant 0 : index
      %c0_52 = arith.constant 0 : index
      %128 = vector.load %arg5[%c0_50, %c0_51, %c0_52] : memref<1x5x1xf32, #tpu.memory_space<vmem>>, vector<1x5x1xf32>
      %129 = vector.shape_cast %128 : vector<1x5x1xf32> to vector<5x1xf32>
      %cst_53 = arith.constant 0.000000e+00 : f32
      %130 = vector.broadcast %cst_53 : f32 to vector<5x1xf32>
      %131 = arith.subf %130, %127 : vector<5x1xf32>
      %132 = arith.mulf %129, %131 : vector<5x1xf32>
      %cst_54 = arith.constant dense<0.000000e+00> : vector<1xf32>
      %133 = vector.multi_reduction <add>, %132, %cst_54 [0] : vector<5x1xf32> to vector<1xf32>
      %134 = vector.shape_cast %133 : vector<1xf32> to vector<1x1xf32>
      %c0_55 = arith.constant 0 : index
      %c0_56 = arith.constant 0 : index
      %c0_57 = arith.constant 0 : index
      %135 = vector.load %arg7[%c0_55, %c0_56, %c0_57] : memref<1x1x1xf32, #tpu.memory_space<vmem>>, vector<1x1x1xf32>
      %136 = vector.shape_cast %135 : vector<1x1x1xf32> to vector<1x1xf32>
      %137 = vector.shape_cast %134 : vector<1x1xf32> to vector<1x1x1xf32>
      tpu.vector_store %arg7[%c0_55, %c0_56, %c0_57], %137 {strides = array<i32>} : memref<1x1x1xf32, #tpu.memory_space<vmem>>, vector<1x1x1xf32>,
    } else {
    }
    return
  }
  func.func @transform_0(%arg0: i32, %arg1: i32) -> (i32, i32, i32) {
    %c0_i32 = arith.constant 0 : i32
    %c0_i32_0 = arith.constant 0 : i32
    return %arg0, %c0_i32, %arg1 : i32, i32, i32
  }
  func.func @transform_1(%arg0: i32, %arg1: i32) -> (i32, i32, i32) {
    %c0_i32 = arith.constant 0 : i32
    %c0_i32_0 = arith.constant 0 : i32
    return %arg0, %arg1, %c0_i32 : i32, i32, i32
  }
  func.func @transform_2(%arg0: i32, %arg1: i32) -> (i32, i32, i32) {
    %c0_i32 = arith.constant 0 : i32
    %c0_i32_0 = arith.constant 0 : i32
    %c0_i32_1 = arith.constant 0 : i32
    return %arg0, %c0_i32, %c0_i32_0 : i32, i32, i32
  }
  func.func @transform_3(%arg0: i32, %arg1: i32) -> (i32, i32, i32) {
    %c0_i32 = arith.constant 0 : i32
    %c0_i32_0 = arith.constant 0 : i32
    %c0_i32_1 = arith.constant 0 : i32
    return %arg0, %c0_i32, %c0_i32_0 : i32, i32, i32
  }
  func.func @transform_4(%arg0: i32, %arg1: i32) -> (i32, i32) {
    %c0_i32 = arith.constant 0 : i32
    %c0_i32_0 = arith.constant 0 : i32
    %c0_i32_1 = arith.constant 0 : i32
    return %c0_i32, %c0_i32_0 : i32, i32
  }
  func.func @transform_5(%arg0: i32, %arg1: i32) -> (i32, i32, i32) {
    %c0_i32 = arith.constant 0 : i32
    %c0_i32_0 = arith.constant 0 : i32
    %c0_i32_1 = arith.constant 0 : i32
    return %arg0, %c0_i32, %c0_i32_0 : i32, i32, i32
  }
}

</mosaic_0001>

<bundles_post_ra>
// kernel: tpu_custom_call.1
= control target key start
LH: loop header
LB: loop body
LE: loop exit
PB: predicated region body
PF: predicated region fallthrough
CT: control target
= control target key end

     0   :  { %s1667_s18 = smov 0   ;;  %s1669_s19 = smov 0   ;;  %s2130_s0 = inlined_call_operand.vmem [shape: s32[2,1,256], index: 0, kind: input, shape index: {}]   ;;  %s2131_s1 = inlined_call_operand.vmem [shape: bf16[2,256,256], index: 1, kind: input, shape index: {}]   ;;  %s2132_s2 = inlined_call_operand.vmem [shape: f32[2,5,5], index: 2, kind: input, shape index: {}]   ;;  %s2133_s3 = inlined_call_operand.vmem [shape: f32[2,5,1], index: 3, kind: input, shape index: {}]   ;;  %s2134_s4 = inlined_call_operand.vmem [shape: bf16[256,320], index: 4, kind: input, shape index: {}]   ;;  %s2135_s5 = inlined_call_operand.vmem [shape: f32[2,1,1], index: 5, kind: output, shape index: {}]  }
   0x1   :  { %s1671_s20 = smov 0   ;;  %s1673_s21 = smov 0  }
   0x2   :  { %s1675_s22 = smov 0  }
   0x3 LB: > { %s24_s23 = sadd.s32 1, %s1622_s20  ;;  %s27_s24 = sadd.s32 1, %s1626_s21  ;;  %s1630_s22 = sphi %s1675_s22, %s15_s22   ;;  %s1626_s21 = sphi %s1673_s21, %s2142_s21   ;;  %s1622_s20 = sphi %s1671_s20, %s2141_s20   ;;  %s1618_s19 = sphi %s1669_s19, %s2140_s19   ;;  %s1614_s18 = sphi %s1667_s18, %s2139_s18  }
   0x4   : > { %p25_p0 = scmp.ge.s32.totalorder %s24_s23, 2  ;;  %p1188_p1 = scmp.ge.s32.totalorder %s1630_s22, 1 }
   0x5   : > { %p239_p2 = scmp.lt.s32.totalorder %s1630_s22, 5 }
   0x6   : > { %s2144_s23 = smov (%p25_p0, %s24_s23), 0  ;;  %s2146_s24 = smov (!%p25_p0, %s27_s24), %s1626_s21 }
   0x7   : > { %p240_p3 = pnand %p1188_p1, %p239_p2  ;;  %p29_p4 = scmp.ge.s32.totalorder %s2146_s24, 2 }
   0x8   : > { %p285_p5 = scmp.lt.s32.totalorder (!%p240_p3), %s1618_s19, 1  ;;  %p287_p6 = scmp.lt.s32.totalorder (!%p240_p3), %s1614_s18, 1 }
   0x9   : > { %s2148_s24 = smov (%p29_p4, %s2146_s24), 0  ;;  %243 = sbr.rel (%p240_p3) target bundleno = 1302 (0x516), region = 40 }
   0xa   : > { %2136 = sst [smem:[#allocation4_spill]] %s2148_s24  ;;  %s1190_s25 = sshll.u32 (!%p240_p3), %s1614_s18, 4 }
   0xb   : > { %p295_p7 = scmp.lt.s32.totalorder (!%p240_p3), %s1190_s25, 31  ;;  %p1196_p8 = scmp.ne.s32.totalorder (!%p240_p3), %s1614_s18, 0 }
   0xe   : > { %s2150_s19 = smov (!%p285_p5, %s1618_s19), 1  ;;  %s2152_s25 = smov (!%p295_p7, %s1190_s25), 31 }
   0xf   : > { %s288_s26 = scalar_select %p287_p6, %s1614_s18, 1 }
  0x10   : > { %s1189_s27 = sshll.u32 %s2150_s19, 1  ;;  %s1192_s29 = sshll.u32 %s2150_s19, 6 }
  0x11   : > { %s1705_s28 = sadd.s32 %s1189_s27, %s288_s26  ;;  %s1194_s8 = sshll.u32 %s2150_s19, 3 }
  0x12   : > { %s1716_s11 = scalar_lea.vmem %s2132_s2, %s1194_s8  ;;  %s1721_s14 = scalar_lea.vmem %s2133_s3, %s1194_s8 }
  0x13   : > { %s1191_s15 = sshll.u32 %s2152_s25, 1  ;;  %s313_s26 = scalar_lea.vmem %s2135_s5, %s2150_s19 }
  0x14   : > { %s299_s27 = sadd.s32 %s1192_s29, %s1191_s15  ;;  %317 = sbr.rel (%p1196_p8) target bundleno = 29 (0x1d), region = 44 }
  0x15   : > { %s1193_s30 = sshll.u32 %s299_s27, 2 }
  0x16   : > { %s1730_s24 = scalar_lea.vmem %s2131_s1, %s1193_s30 }
  0x19   : > { %vm320_vm0 = vcmask 4096   ;;  %v1632_v0 = vmov 0.0  }
  0x1a   : > { %318 = vst [vmem:[#allocation2] sm:$0x1f] %v1632_v0 }
  0x1b   : > { %319 = vst [vmem:[#allocation2 + $0x8] sm:$0x1f] %v1632_v0 }
  0x1c   : > { %321 = vst.msk [vmem:[#allocation3] sm:$0x1f] %vm320_vm0, %v1632_v0 }
  0x1d PF: > { %v1256_v1 = vld [vmem:[%s1730_s24 + $0x70] sm:$0xf]  ;;  %v1480_v2 = vld [vmem:[%s1730_s24 + $0x74] sm:$0xf0]  ;;  %v1479_v3 = vld [vmem:[%s1730_s24 + $0x74] sm:$0xf]  ;;  %v339_v18 = vlaneseq  ;;  %s2137_s7 = scalar_lea.vmem %s2130_s0, %s1705_s28 }
  0x1e   : > { %v1257_v4 = vor.u32 %v1480_v2, %v1256_v1  ;;  %v1258_v5 = vld [vmem:[%s1730_s24 + $0x78] sm:$0xf0]  ;;  %v1248_v6 = vld [vmem:[%s1730_s24 + $0x60] sm:$0xf]  ;;  %v1478_v7 = vld [vmem:[%s1730_s24 + $0x64] sm:$0xf0] }
  0x1f   : > { %v1261_v8 = vor.u32 %v1479_v3, %v1258_v5  ;;  %v1477_v9 = vld [vmem:[%s1730_s24 + $0x64] sm:$0xf]  ;;  %v1250_v10 = vld [vmem:[%s1730_s24 + $0x68] sm:$0xf0]  ;;  %v1249_v11 = vor.u32 %v1478_v7, %v1248_v6  ;;  %v1240_v13 = vld [vmem:[%s1730_s24 + $0x50] sm:$0xf] }
  0x20   : > { %436 = vmatpush.bf16.msra.mxu0 %v1257_v4  ;;  %v1253_v12 = vor.u32 %v1477_v9, %v1250_v10  ;;  %v1476_v14 = vld [vmem:[%s1730_s24 + $0x54] sm:$0xf0]  ;;  %v1475_v15 = vld [vmem:[%s1730_s24 + $0x54] sm:$0xf]  ;;  %v1242_v16 = vld [vmem:[%s1730_s24 + $0x58] sm:$0xf0] }
  0x21   : > { %449 = vmatpush.bf16.msra.mxu1 %v1261_v8  ;;  %v1241_v17 = vor.u32 %v1476_v14, %v1240_v13  ;;  %v1245_v19 = vor.u32 %v1475_v15, %v1242_v16  ;;  %v1232_v20 = vld [vmem:[%s1730_s24 + $0x40] sm:$0xf]  ;;  %v1474_v21 = vld [vmem:[%s1730_s24 + $0x44] sm:$0xf0]  ;;  %v1473_v22 = vld [vmem:[%s1730_s24 + $0x44] sm:$0xf] }
  0x22   : > { %v1234_v23 = vld [vmem:[%s1730_s24 + $0x48] sm:$0xf0]  ;;  %v1233_v24 = vor.u32 %v1474_v21, %v1232_v20  ;;  %v1749_v25 = vshrl.u32 %v339_v18, 7  ;;  %v1574_v26 = vld [vmem:[%s2137_s7] ss:$0 sm:$0xff]  ;;  %vm346_vm1 = vcmask 1044480  }
  0x23   : > { %v1237_v27 = vor.u32 %v1473_v22, %v1234_v23  ;;  %v1224_v28 = vld [vmem:[%s1730_s24 + $0x30] sm:$0xf]  ;;  %v1472_v29 = vld [vmem:[%s1730_s24 + $0x34] sm:$0xf0]  ;;  %v1471_v30 = vld [vmem:[%s1730_s24 + $0x34] sm:$0xf] }
  0x24   : > { %437 = vmatpush.bf16.msra.mxu0 %v1249_v11  ;;  %v1226_v31 = vld [vmem:[%s1730_s24 + $0x38] sm:$0xf0]  ;;  %vm342_vm2 = vcmp.eq.s32.totalorder %v1574_v26, %v1749_v25  ;;  %v1633_v32 = vmov 0.0   ;;  %v1225_v34 = vor.u32 %v1472_v29, %v1224_v28  ;;  %v1216_v37 = vld [vmem:[%s1730_s24 + $0x20] sm:$0xf]  ;;  %vm351_vm4 = vcmask 4096  }
  0x25   : > { %450 = vmatpush.bf16.msra.mxu1 %v1253_v12  ;;  %v1197_v33 = vsel %vm342_vm2, 1.0, %v1633_v32  ;;  %v1229_v36 = vor.u32 %v1471_v30, %v1226_v31  ;;  %v1470_v38 = vld [vmem:[%s1730_s24 + $0x24] sm:$0xf0]  ;;  %v1469_v39 = vld [vmem:[%s1730_s24 + $0x24] sm:$0xf]  ;;  %vm1262_vm3 = vmpackc.low %vm342_vm2, %vm342_vm2  ;;  %p1266_p9 = scmp.ne.s32.totalorder %s1614_s18, 1 }
  0x26   : > { %v347_v35 = vsel %vm346_vm1, %v1197_v33, 0.0  ;;  %v1218_v40 = vld [vmem:[%s1730_s24 + $0x28] sm:$0xf0]  ;;  %v1217_v41 = vor.u32 %v1470_v38, %v1216_v37  ;;  %v1208_v43 = vld [vmem:[%s1730_s24 + $0x10] sm:$0xf]  ;;  %s1636_s27 = smov (!%p1266_p9), 64  }
  0x27   : > { %348 = vadd.xlane.f32.xlu0 %v347_v35  ;;  %v1221_v42 = vor.u32 %v1469_v39, %v1218_v40  ;;  %v1468_v44 = vld [vmem:[%s1730_s24 + $0x14] sm:$0xf0]  ;;  %v1467_v45 = vld [vmem:[%s1730_s24 + $0x14] sm:$0xf]  ;;  %v1210_v46 = vld [vmem:[%s1730_s24 + $0x18] sm:$0xf0] }
  0x28   : > { %438 = vmatpush.bf16.msra.mxu0 %v1241_v17  ;;  %v1209_v47 = vor.u32 %v1468_v44, %v1208_v43  ;;  %v1213_v48 = vor.u32 %v1467_v45, %v1210_v46  ;;  %v1200_v49 = vld [vmem:[%s1730_s24] sm:$0xf]  ;;  %v1466_v50 = vld [vmem:[%s1730_s24 + $0x4] sm:$0xf0]  ;;  %v1465_v51 = vld [vmem:[%s1730_s24 + $0x4] sm:$0xf] }
  0x29   : > { %451 = vmatpush.bf16.msra.mxu1 %v1245_v19  ;;  %v1202_v52 = vld [vmem:[%s1730_s24 + $0x8] sm:$0xf0]  ;;  %v1201_v53 = vor.u32 %v1466_v50, %v1200_v49  ;;  %v1634_v55 = vmov 1.0|1.0   ;;  %v343_v56 = vld [vmem:[#allocation3] sm:$0x1f] }
  0x2a   : > { %v1205_v54 = vor.u32 %v1465_v51, %v1202_v52  ;;  %v353_v59 = vld [vmem:[#allocation2] sm:$0x1f]  ;;  %v354_v60 = vld [vmem:[#allocation2 + $0x8] sm:$0x1f] }
  0x2c   : > { %439 = vmatpush.bf16.msra.mxu0 %v1233_v24 }
  0x2d   : > { %452 = vmatpush.bf16.msra.mxu1 %v1237_v27 }
  0x30   : > { %440 = vmatpush.bf16.msra.mxu0 %v1225_v34 }
  0x31   : > { %453 = vmatpush.bf16.msra.mxu1 %v1229_v36 }
  0x34   : > { %441 = vmatpush.bf16.msra.mxu0 %v1217_v41 }
  0x35   : > { %454 = vmatpush.bf16.msra.mxu1 %v1221_v42 }
  0x38   : > { %442 = vmatpush.bf16.msra.mxu0 %v1209_v47 }
  0x39   : > { %455 = vmatpush.bf16.msra.mxu1 %v1213_v48 }
  0x3c   : > { %443 = vmatpush.bf16.msra.mxu0 %v1201_v53 }
  0x3d   : > { %456 = vmatpush.bf16.msra.mxu1 %v1205_v54 }
  0x3f   : > { %1263 = vmatmul.msk.bf16.vlgmr.msra.gmra.mxu0 %vm1262_vm3, %v1634_v55 }
  0x40   : > { %1265 = vmatmul.msk.bf16.vlgmr.msra.gmra.mxu1 %vm1262_vm3, %v1634_v55 }
  0x9a   : > { %v349_v57 = vpop.xlane.xlu0 %348 }
  0x9b   : > { %v350_v58 = vadd.f32 %v349_v57, %v343_v56 }
  0x9d   : > { %352 = vst.msk [vmem:[#allocation3] sm:$0x1f] %vm351_vm4, %v350_v58 }
  0xbc   : > { %v445_v61 = vpop.f32.mrf.mxu0 }
  0xbd   : > { %v462_v62 = vadd.f32 %v445_v61, %v353_v59  ;;  %v458_v63 = vpop.f32.mrf.mxu1 }
  0xbe   : > { %v463_v0 = vadd.f32 %v458_v63, %v354_v60 }
  0xbf   : > { %464 = vst [vmem:[#allocation2] sm:$0x1f] %v462_v62 }
  0xc0   : > { %465 = vst [vmem:[#allocation2 + $0x8] sm:$0x1f] %v463_v0 }
  0xc1   : > { %469 = sbr.rel (%p1266_p9) target bundleno = 1302 (0x516), region = 48 }
  0xc4   : > { %v447_v1 = vpop.f32.mrf.mxu0 }
  0xc5   : > { %v460_v2 = vpop.f32.mrf.mxu1 }
  0xc6   : > { %v472_v3 = vld [vmem:[#allocation3] sm:$0x1f]  ;;  %v1635_v4 = vmov 0   ;;  %v470_v14 = vld [vmem:[#allocation2] sm:$0x1f]  ;;  %vm496_vm9 = vcmask 39936  }
  0xc7   : > { %1575 = vset.pattern.permute.xlu0 %v1635_v4  ;;  %v473_v5 = vmax.f32 %v472_v3, 1.0  ;;  %v471_v16 = vld [vmem:[#allocation2 + $0x8] sm:$0x1f]  ;;  %v495_v21 = vld [vmem:[%s1716_s11] sm:$0x1f]  ;;  %vm986_vm0 = vcmask 520192  }
  0xc8   : > { %v1357_v30 = vld [vmem:[%s2134_s4 + $0xa8] sm:$0xf]  ;;  %v1503_v31 = vld [vmem:[%s2134_s4 + $0xb0] sm:$0xf0]  ;;  %v1345_v36 = vld [vmem:[%s2134_s4 + $0x90] sm:$0xf] }
  0xc9   : > { %476 = vperm.xlu0 %1575, %v473_v5   ;;  %v1453_v32 = vld [vmem:[%s2134_s4 + $0x168] sm:$0xf]  ;;  %v1358_v33 = vor.u32 %v1503_v31, %v1357_v30  ;;  %v1527_v34 = vld [vmem:[%s2134_s4 + $0x170] sm:$0xf0]  ;;  %v1500_v37 = vld [vmem:[%s2134_s4 + $0x98] sm:$0xf0] }
  0xca   : > { %v1454_v35 = vor.u32 %v1527_v34, %v1453_v32  ;;  %v1441_v38 = vld [vmem:[%s2134_s4 + $0x150] sm:$0xf]  ;;  %v1346_v39 = vor.u32 %v1500_v37, %v1345_v36  ;;  %v1524_v40 = vld [vmem:[%s2134_s4 + $0x158] sm:$0xf0]  ;;  %v1333_v42 = vld [vmem:[%s2134_s4 + $0x78] sm:$0xf] }
  0xcb   : > { %906 = vmatpush.bf16.msra.mxu2 %v1358_v33  ;;  %v1442_v41 = vor.u32 %v1524_v40, %v1441_v38  ;;  %v1497_v43 = vld [vmem:[%s2134_s4 + $0x80] sm:$0xf0]  ;;  %v1429_v44 = vld [vmem:[%s2134_s4 + $0x138] sm:$0xf]  ;;  %v1321_v48 = vld [vmem:[%s2134_s4 + $0x60] sm:$0xf] }
  0xcc   : > { %919 = vmatpush.bf16.msra.mxu3 %v1454_v35  ;;  %v1334_v45 = vor.u32 %v1497_v43, %v1333_v42  ;;  %v1521_v46 = vld [vmem:[%s2134_s4 + $0x140] sm:$0xf0]  ;;  %v1494_v49 = vld [vmem:[%s2134_s4 + $0x68] sm:$0xf0]  ;;  %v1417_v50 = vld [vmem:[%s2134_s4 + $0x120] sm:$0xf] }
  0xcd   : > { %v1430_v47 = vor.u32 %v1521_v46, %v1429_v44  ;;  %v1322_v51 = vor.u32 %v1494_v49, %v1321_v48  ;;  %v1518_v52 = vld [vmem:[%s2134_s4 + $0x128] sm:$0xf0]  ;;  %v1359_v54 = vld [vmem:[%s2134_s4 + $0xb4] sm:$0xf0]  ;;  %v1309_v60 = vld [vmem:[%s2134_s4 + $0x48] sm:$0xf] }
  0xce   : > { %v1502_v53 = vld [vmem:[%s2134_s4 + $0xac] sm:$0xf]  ;;  %v1418_v55 = vor.u32 %v1518_v52, %v1417_v50  ;;  %v1455_v58 = vld [vmem:[%s2134_s4 + $0x174] sm:$0xf0]  ;;  %v1491_v61 = vld [vmem:[%s2134_s4 + $0x50] sm:$0xf0] }
  0xcf   : > { %907 = vmatpush.bf16.msra.mxu2 %v1346_v39  ;;  %v1362_v56 = vor.u32 %v1502_v53, %v1359_v54  ;;  %v1526_v57 = vld [vmem:[%s2134_s4 + $0x16c] sm:$0xf]  ;;  %v1405_v62 = vld [vmem:[%s2134_s4 + $0x108] sm:$0xf]  ;;  %v1310_v63 = vor.u32 %v1491_v61, %v1309_v60  ;;  %v1515_v0 = vld [vmem:[%s2134_s4 + $0x110] sm:$0xf0] }
  0xd0   : > { %920 = vmatpush.bf16.msra.mxu3 %v1442_v41  ;;  %v1458_v59 = vor.u32 %v1526_v57, %v1455_v58  ;;  %v1499_v1 = vld [vmem:[%s2134_s4 + $0x94] sm:$0xf]  ;;  %v1347_v2 = vld [vmem:[%s2134_s4 + $0x9c] sm:$0xf0]  ;;  %v1406_v3 = vor.u32 %v1515_v0, %v1405_v62  ;;  %v1517_v32 = vld [vmem:[%s2134_s4 + $0x124] sm:$0xf] }
  0xd1   : > { %v1350_v4 = vor.u32 %v1499_v1, %v1347_v2  ;;  %v1523_v5 = vld [vmem:[%s2134_s4 + $0x154] sm:$0xf]  ;;  %v1419_v33 = vld [vmem:[%s2134_s4 + $0x12c] sm:$0xf0]  ;;  %v1273_v34 = vld [vmem:[%s2134_s4] sm:$0xf] }
  0xd2   : > { %v1422_v35 = vor.u32 %v1517_v32, %v1419_v33  ;;  %v1482_v36 = vld [vmem:[%s2134_s4 + $0x8] sm:$0xf0]  ;;  %v1369_v37 = vld [vmem:[%s2134_s4 + $0xc0] sm:$0xf]  ;;  %v1311_v42 = vld [vmem:[%s2134_s4 + $0x54] sm:$0xf0] }
  0xd3   : > { %908 = vmatpush.bf16.msra.mxu2 %v1334_v45  ;;  %v1506_v38 = vld [vmem:[%s2134_s4 + $0xc8] sm:$0xf0]  ;;  %v1274_v39 = vor.u32 %v1482_v36, %v1273_v34  ;;  %v1407_v45 = vld [vmem:[%s2134_s4 + $0x114] sm:$0xf0]  ;;  %v1365_v46 = vld [vmem:[%s2134_s4 + $0xb0] sm:$0xf] }
  0xd4   : > { %921 = vmatpush.bf16.msra.mxu3 %v1430_v47  ;;  %v1370_v40 = vor.u32 %v1506_v38, %v1369_v37  ;;  %v1490_v41 = vld [vmem:[%s2134_s4 + $0x4c] sm:$0xf]  ;;  %v1504_v47 = vld [vmem:[%s2134_s4 + $0xb8] sm:$0xf0]  ;;  %v1461_v50 = vld [vmem:[%s2134_s4 + $0x170] sm:$0xf] }
  0xd5   : > { %v1514_v43 = vld [vmem:[%s2134_s4 + $0x10c] sm:$0xf]  ;;  %v1314_v44 = vor.u32 %v1490_v41, %v1311_v42  ;;  %v1366_v49 = vor.u32 %v1504_v47, %v1365_v46  ;;  %v1487_v52 = vld [vmem:[%s2134_s4 + $0x34] sm:$0xf]  ;;  %v1299_v54 = vld [vmem:[%s2134_s4 + $0x3c] sm:$0xf0] }
  0xd6   : > { %v1410_v48 = vor.u32 %v1514_v43, %v1407_v45  ;;  %v1302_v58 = vor.u32 %v1487_v52, %v1299_v54  ;;  %v1501_v60 = vld [vmem:[%s2134_s4 + $0xa0] sm:$0xf0]  ;;  %v1449_v61 = vld [vmem:[%s2134_s4 + $0x158] sm:$0xf]  ;;  %v1484_v2 = vld [vmem:[%s2134_s4 + $0x1c] sm:$0xf] }
  0xd7   : > { %909 = vmatpush.bf16.msra.mxu2 %v1322_v51  ;;  %v1528_v51 = vld [vmem:[%s2134_s4 + $0x178] sm:$0xf0]  ;;  %v1317_v34 = vld [vmem:[%s2134_s4 + $0x50] sm:$0xf]  ;;  %v1305_v41 = vld [vmem:[%s2134_s4 + $0x38] sm:$0xf] }
  0xd8   : > { %922 = vmatpush.bf16.msra.mxu3 %v1418_v55  ;;  %v1462_v53 = vor.u32 %v1528_v51, %v1461_v50  ;;  %v1511_v55 = vld [vmem:[%s2134_s4 + $0xf4] sm:$0xf]  ;;  %v1413_v37 = vld [vmem:[%s2134_s4 + $0x110] sm:$0xf]  ;;  %v1516_v38 = vld [vmem:[%s2134_s4 + $0x118] sm:$0xf0] }
  0xd9   : > { %v1489_v42 = vld [vmem:[%s2134_s4 + $0x40] sm:$0xf0]  ;;  %v1401_v43 = vld [vmem:[%s2134_s4 + $0xf8] sm:$0xf]  ;;  %v1389_v51 = vld [vmem:[%s2134_s4 + $0xe0] sm:$0xf] }
  0xda   : > { %v1513_v45 = vld [vmem:[%s2134_s4 + $0x100] sm:$0xf0]  ;;  %v1510_v52 = vld [vmem:[%s2134_s4 + $0xe8] sm:$0xf0]  ;;  %vm1035_vm2 = vcmp.eq.s32.totalorder %v1749_v25, 3  ;;  %vm1010_vm3 = vcmp.eq.s32.totalorder %v1749_v25, 1 }
  0xdb   : > { %910 = vmatpush.bf16.msra.mxu2 %v1310_v63  ;;  %v1525_v63 = vld [vmem:[%s2134_s4 + $0x160] sm:$0xf0]  ;;  %v1402_v47 = vor.u32 %v1513_v45, %v1401_v43 }
  0xdc   : > { %923 = vmatpush.bf16.msra.mxu3 %v1406_v3  ;;  %v1450_v1 = vor.u32 %v1525_v63, %v1449_v61  ;;  %v1287_v3 = vld [vmem:[%s2134_s4 + $0x24] sm:$0xf0] }
  0xdd   : > { %v1377_v61 = vld [vmem:[%s2134_s4 + $0xc8] sm:$0xf] }
 0x13b   : > { %v477_v6 = vpop.permute.xlu0 %476 }
 0x13c   : > { %1576 = vrcp.f32 %v477_v6  ;;  %v490_v10 = vand.u32 2147483648, %v477_v6  ;;  %v488_v12 = vand.u32 2147483647, %v477_v6  ;;  %vm484_vm6 = vweird.f32 %v477_v6 }
 0x13e   : > { %v491_v15 = vor.u32 1.1754944e-38, %v490_v10  ;;  %vm489_vm8 = vcmp.eq.f32.partialorder %v488_v12, 8.507059e+37  ;;  %v1393_v10 = vld [vmem:[%s2134_s4 + $0xf0] sm:$0xf]  ;;  %v1512_v12 = vld [vmem:[%s2134_s4 + $0xf8] sm:$0xf0] }
 0x142   : > { %v1577_v7 = vpop.eup %1576 }
 0x143   : > { %v480_v8 = vmul.f32 %v1577_v7, %v477_v6  ;;  %vm485_vm5 = vweird.f32 %v1577_v7  ;;  %v1443_v6 = vld [vmem:[%s2134_s4 + $0x15c] sm:$0xf0] }
 0x144   : > { %vm486_vm7 = vmor %vm484_vm6, %vm485_vm5  ;;  %vm1024_vm5 = vcmp.eq.s32.totalorder %v1749_v25, 2  ;;  %vm1049_vm6 = vcmp.eq.s32.totalorder %v1749_v25, 4 }
 0x145   : > { %v481_v9 = vsub.f32 1.0, %v480_v8  ;;  %v1297_v8 = vld [vmem:[%s2134_s4 + $0x30] sm:$0xf] }
 0x147   : > { %v482_v11 = vmul.f32 %v1577_v7, %v481_v9  ;;  %v1488_v9 = vld [vmem:[%s2134_s4 + $0x38] sm:$0xf0] }
 0x149   : > { %v483_v13 = vadd.f32 %v1577_v7, %v482_v11  ;;  %v1298_v11 = vor.u32 %v1488_v9, %v1297_v8  ;;  %v1290_v8 = vor.u32 %v1484_v2, %v1287_v3  ;;  %v1437_v9 = vld [vmem:[%s2134_s4 + $0x140] sm:$0xf] }
 0x14b   : > { %v487_v17 = vsel %vm486_vm7, %v1577_v7, %v483_v13  ;;  %v1446_v7 = vor.u32 %v1523_v5, %v1443_v6  ;;  %v1496_v13 = vld [vmem:[%s2134_s4 + $0x7c] sm:$0xf]  ;;  %911 = vmatpush.bf16.msra.mxu2 %v1298_v11  ;;  %v1383_v5 = vld [vmem:[%s2134_s4 + $0xe4] sm:$0xf0]  ;;  %v1341_v6 = vld [vmem:[%s2134_s4 + $0x80] sm:$0xf] }
 0x14c   : > { %v492_v18 = vsel %vm489_vm8, %v491_v15, %v487_v17  ;;  %v1394_v15 = vor.u32 %v1512_v12, %v1393_v10  ;;  %v1520_v17 = vld [vmem:[%s2134_s4 + $0x13c] sm:$0xf]  ;;  %v1522_v10 = vld [vmem:[%s2134_s4 + $0x148] sm:$0xf0]  ;;  %vm1076_vm7 = vcmask 0  }
 0x14d   : > { %v493_v19 = vmul.f32 %v492_v18, %v470_v14  ;;  %v494_v20 = vmul.f32 %v492_v18, %v471_v16  ;;  %v1335_v14 = vld [vmem:[%s2134_s4 + $0x84] sm:$0xf0] }
 0x14e   : > { %v1338_v16 = vor.u32 %v1496_v13, %v1335_v14  ;;  %v1431_v18 = vld [vmem:[%s2134_s4 + $0x144] sm:$0xf0]  ;;  %924 = vmatpush.bf16.msra.mxu3 %v1394_v15  ;;  %v1481_v13 = vld [vmem:[%s2134_s4 + $0x4] sm:$0xf]  ;;  %v1275_v14 = vld [vmem:[%s2134_s4 + $0xc] sm:$0xf0] }
 0x14f   : > { %1267 = vmatpush.msk.msra.mxu0 %vm346_vm1, %v493_v19  ;;  %1269 = vmatpush.msk.msra.mxu1 %vm346_vm1, %v494_v20  ;;  %v1434_v19 = vor.u32 %v1520_v17, %v1431_v18  ;;  %v1285_v20 = vld [vmem:[%s2134_s4 + $0x18] sm:$0xf]  ;;  %v1505_v15 = vld [vmem:[%s2134_s4 + $0xc4] sm:$0xf]  ;;  %v1371_v17 = vld [vmem:[%s2134_s4 + $0xcc] sm:$0xf0] }
 0x150   : > { %1268 = vmatmul.msk.f32.vlgmr.msra.gmra.mxu0 %vm496_vm9, %v495_v21  ;;  %1270 = vmatmul.msk.f32.vlgmr.msra.gmra.mxu1 %vm496_vm9, %v495_v21  ;;  %v1485_v21 = vld [vmem:[%s2134_s4 + $0x20] sm:$0xf0]  ;;  %v1329_v18 = vld [vmem:[%s2134_s4 + $0x68] sm:$0xf] }
 0x151   : > { %932 = vmatpush.bf16.msrb.mxu0 %v1362_v56  ;;  %945 = vmatpush.bf16.msrb.mxu1 %v1458_v59  ;;  %v1395_v56 = vld [vmem:[%s2134_s4 + $0xfc] sm:$0xf0]  ;;  %v1353_v59 = vld [vmem:[%s2134_s4 + $0x98] sm:$0xf] }
 0x152   : > { %v1398_v62 = vor.u32 %v1511_v55, %v1395_v56  ;;  %v1354_v0 = vor.u32 %v1501_v60, %v1353_v59  ;;  %v1281_v59 = vld [vmem:[%s2134_s4 + $0x8] sm:$0xf]  ;;  %v1483_v60 = vld [vmem:[%s2134_s4 + $0x10] sm:$0xf0] }
 0x153   : > { %v1282_v63 = vor.u32 %v1483_v60, %v1281_v59 }
 0x155   : > { %933 = vmatpush.bf16.msrb.mxu0 %v1350_v4  ;;  %946 = vmatpush.bf16.msrb.mxu1 %v1446_v7  ;;  %v1508_v4 = vld [vmem:[%s2134_s4 + $0xdc] sm:$0xf]  ;;  %v1498_v7 = vld [vmem:[%s2134_s4 + $0x88] sm:$0xf0] }
 0x156   : > { %v1386_v11 = vor.u32 %v1508_v4, %v1383_v5  ;;  %v1342_v12 = vor.u32 %v1498_v7, %v1341_v6 }
 0x159   : > { %934 = vmatpush.bf16.msrb.mxu0 %v1338_v16  ;;  %947 = vmatpush.bf16.msrb.mxu1 %v1434_v19  ;;  %v1438_v16 = vor.u32 %v1522_v10, %v1437_v9  ;;  %v1495_v19 = vld [vmem:[%s2134_s4 + $0x70] sm:$0xf0] }
 0x15d   : > { %948 = vmatpush.bf16.msrb.mxu1 %v1422_v35  ;;  %v1492_v35 = vld [vmem:[%s2134_s4 + $0x58] sm:$0xf0] }
 0x15e   : > { %v1318_v36 = vor.u32 %v1492_v35, %v1317_v34 }
 0x161   : > { %949 = vmatpush.bf16.msrb.mxu1 %v1410_v48  ;;  %v1293_v48 = vld [vmem:[%s2134_s4 + $0x20] sm:$0xf] }
 0x165   : > { %950 = vmatpush.bf16.msrb.mxu1 %v1398_v62 }
 0x169   : > { %951 = vmatpush.bf16.msrb.mxu1 %v1386_v11 }
 0x1cd   : > { %v1784_v22 = vpop.f32.mrf.mxu0  ;;  %v1786_v23 = vpop.f32.mrf.mxu1 }
 0x1ce   : > { %v546_v24 = vmul.f32 %v1784_v22, %v1784_v22  ;;  %v547_v26 = vmul.f32 %v1786_v23, %v1786_v23 }
 0x1d0   : > { %v548_v27 = vsel %vm346_vm1, %v546_v24, 0.0  ;;  %v549_v28 = vsel %vm346_vm1, %v547_v26, 0.0  ;;  %v1381_v24 = vld [vmem:[%s2134_s4 + $0xd8] sm:$0xf]  ;;  %v1286_v26 = vor.u32 %v1485_v21, %v1285_v20  ;;  %v1425_v21 = vld [vmem:[%s2134_s4 + $0x128] sm:$0xf] }
 0x1d1   : > { %v550_v29 = vadd.f32 %v549_v28, %v548_v27  ;;  %v1509_v27 = vld [vmem:[%s2134_s4 + $0xe0] sm:$0xf0] }
 0x1d2   : > { %v1493_v28 = vld [vmem:[%s2134_s4 + $0x64] sm:$0xf]  ;;  %v1382_v30 = vor.u32 %v1509_v27, %v1381_v24  ;;  %912 = vmatpush.bf16.msra.mxu2 %v1286_v26  ;;  %v1519_v24 = vld [vmem:[%s2134_s4 + $0x130] sm:$0xf0]  ;;  %v1278_v27 = vor.u32 %v1481_v13, %v1275_v14 }
 0x1d3   : > { %551 = vadd.xlane.f32.xlu0 %v550_v29  ;;  %v1323_v29 = vld [vmem:[%s2134_s4 + $0x6c] sm:$0xf0] }
 0x1d4   : > { %v1326_v31 = vor.u32 %v1493_v28, %v1323_v29  ;;  %925 = vmatpush.bf16.msra.mxu3 %v1382_v30  ;;  %v1374_v28 = vor.u32 %v1505_v15, %v1371_v17  ;;  %v1330_v29 = vor.u32 %v1495_v19, %v1329_v18 }
 0x1d6   : > { %935 = vmatpush.bf16.msrb.mxu0 %v1326_v31  ;;  %913 = vmatpush.bf16.msra.mxu2 %v1274_v39  ;;  %v1426_v31 = vor.u32 %v1519_v24, %v1425_v21 }
 0x1d7   : > { %952 = vmatpush.bf16.msrb.mxu1 %v1374_v28 }
 0x1d8   : > { %926 = vmatpush.bf16.msra.mxu3 %v1370_v40  ;;  %v1414_v40 = vor.u32 %v1516_v38, %v1413_v37 }
 0x1da   : > { %936 = vmatpush.bf16.msrb.mxu0 %v1314_v44  ;;  %958 = vmatpush.bf16.msrb.mxu2 %v1366_v49  ;;  %v1306_v44 = vor.u32 %v1489_v42, %v1305_v41  ;;  %v1486_v49 = vld [vmem:[%s2134_s4 + $0x28] sm:$0xf0] }
 0x1db   : > { %v1294_v55 = vor.u32 %v1486_v49, %v1293_v48 }
 0x1dc   : > { %971 = vmatpush.bf16.msrb.mxu3 %v1462_v53 }
 0x1de   : > { %937 = vmatpush.bf16.msrb.mxu0 %v1302_v58  ;;  %959 = vmatpush.bf16.msrb.mxu2 %v1354_v0  ;;  %v1390_v58 = vor.u32 %v1510_v52, %v1389_v51 }
 0x1e0   : > { %972 = vmatpush.bf16.msrb.mxu3 %v1450_v1 }
 0x1e2   : > { %938 = vmatpush.bf16.msrb.mxu0 %v1290_v8  ;;  %960 = vmatpush.bf16.msrb.mxu2 %v1342_v12 }
 0x1e4   : > { %973 = vmatpush.bf16.msrb.mxu3 %v1438_v16 }
 0x1e6   : > { %939 = vmatpush.bf16.msrb.mxu0 %v1278_v27  ;;  %961 = vmatpush.bf16.msrb.mxu2 %v1330_v29 }
 0x1e8   : > { %974 = vmatpush.bf16.msrb.mxu3 %v1426_v31 }
 0x1ea   : > { %962 = vmatpush.bf16.msrb.mxu2 %v1318_v36 }
 0x1ec   : > { %975 = vmatpush.bf16.msrb.mxu3 %v1414_v40 }
 0x1ee   : > { %963 = vmatpush.bf16.msrb.mxu2 %v1306_v44 }
 0x1f0   : > { %976 = vmatpush.bf16.msrb.mxu3 %v1402_v47 }
 0x1f2   : > { %964 = vmatpush.bf16.msrb.mxu2 %v1294_v55 }
 0x1f4   : > { %977 = vmatpush.bf16.msrb.mxu3 %v1390_v58 }
 0x1f6   : > { %965 = vmatpush.bf16.msrb.mxu2 %v1282_v63 }
 0x246   : > { %v1974_v57 = vpop.xlane.xlu0 %551 }
 0x247   : > { %1578 = vrsqrt.f32 %v1974_v57  ;;  %vm560_vm10 = vcmp.eq.f32.partialorder %v1974_v57, inf  ;;  %v563_v50 = vand.u32 2147483648, %v1974_v57  ;;  %vm562_vm11 = vcmp.eq.f32.partialorder %v1974_v57, 0.0 }
 0x24d   : > { %v1579_v20 = vpop.eup %1578 }
 0x24e   : > { %v554_v26 = vmul.f32 %v1579_v20, %v1974_v57 }
 0x250   : > { %v555_v30 = vmul.f32 %v1579_v20, %v554_v26 }
 0x252   : > { %v556_v32 = vmul.f32 0.5, %v555_v30 }
 0x254   : > { %v557_v33 = vsub.f32 1.5, %v556_v32 }
 0x256   : > { %v558_v39 = vmul.f32 %v1579_v20, %v557_v33 }
 0x258   : > { %v559_v46 = vmul.f32 %v558_v39, %v1974_v57 }
 0x25a   : > { %v561_v53 = vsel %vm560_vm10, %v1974_v57, %v559_v46  ;;  %v1507_v57 = vld [vmem:[%s2134_s4 + $0xd0] sm:$0xf0] }
 0x25b   : > { %v564_v54 = vsel %vm562_vm11, %v563_v50, %v561_v53  ;;  %v1378_v0 = vor.u32 %v1507_v57, %v1377_v61 }
 0x25c   : > { %v565_v56 = vmax.f32 %v564_v54, 1e-12 }
 0x25d   : > { %978 = vmatpush.bf16.msrb.mxu3 %v1378_v0 }
 0x25e   : > { %v566_v62 = vmul.f32 0.2, %v565_v56 }
 0x260   : > { %1580 = vrcp.f32 %v566_v62  ;;  %v578_v4 = vand.u32 2147483648, %v566_v62  ;;  %v576_v6 = vand.u32 2147483647, %v566_v62  ;;  %vm572_vm13 = vweird.f32 %v566_v62 }
 0x262   : > { %v579_v8 = vor.u32 1.1754944e-38, %v578_v4  ;;  %vm577_vm15 = vcmp.eq.f32.partialorder %v576_v6, 8.507059e+37 }
 0x266   : > { %v1581_v1 = vpop.eup %1580 }
 0x267   : > { %v568_v2 = vmul.f32 %v1581_v1, %v566_v62  ;;  %vm573_vm12 = vweird.f32 %v1581_v1 }
 0x268   : > { %vm574_vm14 = vmor %vm572_vm13, %vm573_vm12 }
 0x269   : > { %v569_v3 = vsub.f32 1.0, %v568_v2 }
 0x26b   : > { %v570_v5 = vmul.f32 %v1581_v1, %v569_v3 }
 0x26d   : > { %v571_v7 = vadd.f32 %v1581_v1, %v570_v5 }
 0x26f   : > { %v575_v9 = vsel %vm574_vm14, %v1581_v1, %v571_v7 }
 0x270   : > { %v580_v10 = vsel %vm577_vm15, %v579_v8, %v575_v9 }
 0x271   : > { %v582_v11 = vmul.f32 %v580_v10, %v1784_v22  ;;  %v583_v12 = vmul.f32 %v580_v10, %v1786_v23 }
 0x273   : > { %v584_v13 = vpack.c.bf16 %v582_v11, %v582_v11  ;;  %v585_v14 = vpack.c.bf16 %v583_v12, %v583_v12 }
 0x275   : > { %914 = vmatmul.bf16.vlgmr.msra.gmra.mxu2 %v584_v13  ;;  %927 = vmatmul.bf16.vlgmr.msra.gmra.mxu3 %v585_v14 }
 0x276   : > { %940 = vmatmul.bf16.vlgmr.msrb.gmra.mxu0 %v584_v13  ;;  %953 = vmatmul.bf16.vlgmr.msrb.gmra.mxu1 %v585_v14 }
 0x285   : > { %966 = vmatmul.bf16.vlgmr.msrb.gmra.mxu2 %v584_v13  ;;  %979 = vmatmul.bf16.vlgmr.msrb.gmra.mxu3 %v585_v14 }
 0x2f3   : > { %v941_v15 = vpop.f32.mrf.mxu0  ;;  %v954_v16 = vpop.f32.mrf.mxu1 }
 0x2f4   : > { %v955_v22 = vadd.f32 %v954_v16, %v941_v15 }
 0x2f6   : > { %v985_v29 = vsel %vm346_vm1, %v955_v22, -inf }
 0x2f8   : > { %v915_v17 = vpop.f32.mrf.mxu2  ;;  %v928_v18 = vpop.f32.mrf.mxu3 }
 0x2f9   : > { %v929_v26 = vadd.f32 %v928_v18, %v915_v17 }
 0x2fb   : > { %v943_v19 = vpop.f32.mrf.mxu0  ;;  %v956_v20 = vpop.f32.mrf.mxu1  ;;  %v984_v23 = vsel %vm346_vm1, %v929_v26, -inf  ;;  %vm999_vm1 = vcmp.eq.s32.totalorder %v1749_v25, 0 }
 0x2fc   : > { %v988_v31 = vmax.f32 %v984_v23, %v985_v29  ;;  %v1066_v20 = vld [vmem:[%s1721_s14] sm:$0x1f] }
 0x300   : > { %v917_v21 = vpop.f32.mrf.mxu2  ;;  %v930_v24 = vpop.f32.mrf.mxu3 }
 0x308   : > { %v967_v27 = vpop.f32.mrf.mxu2  ;;  %v980_v28 = vpop.f32.mrf.mxu3 }
 0x309   : > { %v981_v30 = vadd.f32 %v980_v28, %v967_v27 }
 0x30b   : > { %v987_v32 = vsel %vm986_vm0, %v981_v30, -inf }
 0x30c   : > { %v989_v33 = vmax.f32 %v988_v31, %v987_v32 }
 0x30e   : > { %990 = vmax.xlane.f32.xlu1 %v989_v33 }
 0x310   : > { %v969_v34 = vpop.f32.mrf.mxu2  ;;  %v982_v35 = vpop.f32.mrf.mxu3 }
 0x381   : > { %v991_v36 = vpop.xlane.xlu1 %990 }
 0x382   : > { %v992_v37 = vsub.f32 %v929_v26, %v991_v36  ;;  %v1017_v38 = vsub.f32 %v955_v22, %v991_v36  ;;  %v1042_v46 = vsub.f32 %v981_v30, %v991_v36 }
 0x384   : > { %v993_v39 = vmul.f32 1.442695, %v992_v37  ;;  %v1036_v40 = vsel %vm1035_vm2, %v1017_v38, 0.0  ;;  %v1011_v41 = vsel %vm1010_vm3, %v992_v37, 0.0  ;;  %v1018_v42 = vmul.f32 1.442695, %v1017_v38 }
 0x385   : > { %1038 = vrot.lane.b32.xlu2 %v1036_v40, %s1636_s27  ;;  %1013 = vrot.lane.b32.xlu1 %v1011_v41, %s1636_s27  ;;  %v1043_v47 = vmul.f32 1.442695, %v1042_v46  ;;  %v1000_v58 = vsel %vm999_vm1, %v992_v37, 0.0  ;;  %v1025_v60 = vsel %vm1024_vm5, %v1017_v38, 0.0  ;;  %v1050_v62 = vsel %vm1049_vm6, %v1042_v46, 0.0 }
 0x386   : > { %1582 = vpow2.f32 %v993_v39 }
 0x387   : > { %1584 = vpow2.f32 %v1018_v42 }
 0x388   : > { %1586 = vpow2.f32 %v1043_v47 }
 0x38c   : > { %v1583_v43 = vpop.eup %1582 }
 0x38d   : > { %1003 = vrot.lane.b32.xlu2 %v1583_v43, %s1636_s27  ;;  %v1585_v44 = vpop.eup %1584  ;;  %v995_v48 = vsel %vm986_vm0, %v1583_v43, 0.0 }
 0x38e   : > { %v1020_v45 = vsel %vm986_vm0, %v1585_v44, 0.0  ;;  %v1587_v49 = vpop.eup %1586 }
 0x38f   : > { %1021 = vadd.xlane.f32.xlu0 %v1020_v45  ;;  %v1045_v50 = vsel %vm986_vm0, %v1587_v49, 0.0 }
 0x395   : > { %1028 = vrot.lane.b32.xlu2 %v1585_v44, %s1636_s27 }
 0x3be   : > { %996 = vadd.xlane.f32.xlu2 %v995_v48 }
 0x3c6   : > { %1046 = vadd.xlane.f32.xlu2 %v1045_v50 }
 0x3df   : > { %v1039_v51 = vpop.permute.xlu2 %1038 }
 0x3e7   : > { %v1004_v52 = vpop.permute.xlu2 %1003 }
 0x3e8   : > { %v1006_v53 = vsel %vm986_vm0, %v1004_v52, 0.0 }
 0x3e9   : > { %1007 = vadd.xlane.f32.xlu1 %v1006_v53 }
 0x3ef   : > { %v1029_v54 = vpop.permute.xlu2 %1028 }
 0x3f0   : > { %v1031_v55 = vsel %vm986_vm0, %v1029_v54, 0.0 }
 0x3f1   : > { %1032 = vadd.xlane.f32.xlu0 %v1031_v55 }
 0x3f7   : > { %v1014_v56 = vpop.permute.xlu1 %1013 }
 0x3f8   : > { %v1016_v59 = vadd.f32 %v1014_v56, %v1000_v58 }
 0x3fa   : > { %v1026_v61 = vadd.f32 %v1025_v60, %v1016_v59 }
 0x3fc   : > { %v1041_v57 = vadd.f32 %v1039_v51, %v1026_v61 }
 0x3fe   : > { %v1051_v63 = vadd.f32 %v1050_v62, %v1041_v57 }
 0x400   : > { %v1052_v0 = vmul.f32 1.442695, %v1051_v63 }
 0x402   : > { %1588 = vpow2.f32 %v1052_v0  ;;  %v1022_v3 = vpop.xlane.xlu0 %1021 }
 0x408   : > { %v1589_v1 = vpop.eup %1588 }
 0x409   : > { %v1054_v2 = vsel %vm986_vm0, %v1589_v1, 0.0 }
 0x40a   : > { %1055 = vadd.xlane.f32.xlu0 %v1054_v2 }
 0x431   : > { %v997_v5 = vpop.xlane.xlu2 %996 }
 0x439   : > { %v1047_v10 = vpop.xlane.xlu2 %1046 }
 0x45c   : > { %v1008_v4 = vpop.xlane.xlu1 %1007 }
 0x45d   : > { %v1009_v6 = vadd.f32 %v1008_v4, %v997_v5 }
 0x45f   : > { %v1023_v8 = vadd.f32 %v1022_v3, %v1009_v6 }
 0x464   : > { %v1033_v7 = vpop.xlane.xlu0 %1032 }
 0x465   : > { %v1034_v9 = vadd.f32 %v1033_v7, %v1023_v8 }
 0x467   : > { %v1048_v25 = vadd.f32 %v1047_v10, %v1034_v9 }
 0x47d   : > { %v1056_v11 = vpop.xlane.xlu0 %1055 }
 0x47e   : > { %v1057_v12 = vsub.f32 %v1048_v25, %v1056_v11 }
 0x480   : > { %v1058_v13 = vadd.f32 %v1589_v1, %v1057_v12 }
 0x482   : > { %1590 = vlog2.f32 %v1058_v13 }
 0x488   : > { %v1591_v14 = vpop.eup %1590 }
 0x489   : > { %v1060_v15 = vmul.f32 0.6931472, %v1591_v14 }
 0x48b   : > { %v1061_v16 = vsub.f32 %v1051_v63, %v1060_v15 }
 0x48d   : > { %v1062_v17 = vsel %vm986_vm0, %v1061_v16, 0.0 }
 0x48e   : > { %1063 = vadd.xlane.f32.xlu2 %v1062_v17 }
 0x501   : > { %v1064_v18 = vpop.xlane.xlu2 %1063 }
 0x502   : > { %v1065_v19 = vmul.f32 0.015625, %v1064_v18 }
 0x504   : > { %v1067_v21 = vsub.f32 0.0, %v1065_v19 }
 0x506   : > { %v1068_v24 = vmul.f32 %v1067_v21, %v1066_v20 }
 0x508   : > { %v1069_v26 = vsel %vm351_vm4, %v1068_v24, 0.0 }
 0x509   : > { %v1070_v22 = vrot.slane %v1069_v26, 4 }
 0x50b   : > { %v1071_v23 = vadd.f32 %v1070_v22, %v1069_v26 }
 0x50d   : > { %v1072_v27 = vrot.slane %v1071_v23, 2 }
 0x50f   : > { %v1073_v28 = vadd.f32 %v1072_v27, %v1071_v23 }
 0x511   : > { %v1074_v29 = vrot.slane %v1073_v28, 1 }
 0x513   : > { %v1075_v30 = vadd.f32 %v1074_v29, %v1073_v28 }
 0x515   : > { %1077 = vst.msk [vmem:[%s313_s26] sm:$0x1] %vm1076_vm7, %v1075_v30 }
 0x516 PF: > { %s15_s22 = sadd.s32 1, %s1630_s22   ;;  %s2138_s14 = sld [smem:[#allocation4_spill]] }
 0x517   : > { %p12_p10 = scmp.ge.s32.totalorder %s15_s22, 6   ;;  %s2139_s18 = smov %s1622_s20 }
 0x518   : > { %s2140_s19 = smov %s1626_s21  ;;  %s2141_s20 = smov %s2144_s23 }
 0x519   :  { %14 = sbr.rel (!%p12_p10) target bundleno = 3 (0x3), region = 87 }
 0x51c   : > { %s2142_s21 = smov %s2138_s14 }

</bundles_post_ra>
